<compile_context>
chip_gen: v6e
topology: v6e:2x2x1
jax: 0.10.0
libtpu: 0.0.40
codegen_flags: <defaults>
</compile_context>

<pallas_src>
import jax
import jax.numpy as jnp
from jax.experimental import pallas as pl
from jax.experimental.pallas import tpu as pltpu

_LANES = 128            # lane width of a vreg
_SUBLANES = 8           # sublane count of a vreg
_MAX_BLOCK_ROWS = 2048  # 2048 x 128 x 4B = 1 MiB per f32 block (2 MiB double-buffered)


def _cdiv(a, b):
    return -(-a // b)


def _round_up(a, b):
    return _cdiv(a, b) * b


def _sum_sq_shifted(x, shift):
    """sum((x - shift)^2) over all elements of x, as a Pallas streaming reduction."""
    n = int(x.size)
    flat = x.reshape(-1)

    rows = _cdiv(n, _LANES)
    block_rows = min(_round_up(rows, _SUBLANES), _MAX_BLOCK_ROWS)
    n_blocks = _cdiv(rows, block_rows)
    n_cores = 2 if n_blocks >= 2 else 1          # megacore split (v7x); no-op on v5e/v6e
    blocks_per_core = _cdiv(n_blocks, n_cores)
    rows_padded = n_cores * blocks_per_core * block_rows
    total_padded = rows_padded * _LANES

    if total_padded > n:
        # Pad with `shift` so padded elements contribute (shift - shift)^2 == 0.
        flat = jnp.pad(flat, (0, total_padded - n), constant_values=shift)
    x3 = flat.reshape(n_cores, blocks_per_core * block_rows, _LANES)

    def kernel(x_ref, out_ref):
        i = pl.program_id(1)

        @pl.when(i == 0)
        def _():
            out_ref[...] = jnp.zeros_like(out_ref)

        xv = x_ref[0].astype(jnp.float32)                 # (block_rows, 128)
        d = xv - jnp.float32(shift)
        sq = d * d
        # Fold the block down to one vreg worth of partial sums (elementwise
        # vreg adds only); the final cross-lane/sublane reduce is done once,
        # outside the kernel.
        partial = jnp.sum(
            sq.reshape(block_rows // _SUBLANES, _SUBLANES, _LANES), axis=0)
        out_ref[...] += partial[None]

    itemsize = jnp.dtype(x.dtype).itemsize
    out = pl.pallas_call(
        kernel,
        out_shape=jax.ShapeDtypeStruct((n_cores, _SUBLANES, _LANES), jnp.float32),
        grid_spec=pltpu.PrefetchScalarGridSpec(
            num_scalar_prefetch=0,
            grid=(n_cores, blocks_per_core),
            in_specs=[
                pl.BlockSpec((1, block_rows, _LANES), lambda c, i: (c, i, 0)),
            ],
            out_specs=pl.BlockSpec((1, _SUBLANES, _LANES), lambda c, i: (c, 0, 0)),
        ),
        compiler_params=pltpu.CompilerParams(
            dimension_semantics=("parallel", "arbitrary"),
            vmem_limit_bytes=32 * 1024 * 1024,
        ),
        cost_estimate=pl.CostEstimate(
            flops=3 * n,
            transcendentals=0,
            bytes_accessed=n * itemsize + n_cores * _SUBLANES * _LANES * 4,
        ),
    )(x3)
    return jnp.sum(out)


def discriminate_loss(real_outputs, fake_outputs):
    """Pallas implementation of Discriminate_Loss.forward."""
    n_real = float(real_outputs.size)
    n_fake = float(fake_outputs.size)
    sum_real = _sum_sq_shifted(real_outputs, 1.0)   # sum((real - 1)^2)
    sum_fake = _sum_sq_shifted(fake_outputs, 0.0)   # sum(fake^2)
    return sum_real / (2.0 * n_real) + sum_fake / (2.0 * n_fake)


def _reference_loss(real, fake):
    """Plain-JAX reference matching the PyTorch forward exactly."""
    real = real.astype(jnp.float32)
    fake = fake.astype(jnp.float32)
    return jnp.mean((real - 1.0) ** 2 / 2.0) + jnp.mean(fake ** 2 / 2.0)


if __name__ == "__main__":
    key = jax.random.PRNGKey(0)
    k1, k2 = jax.random.split(key)
    N, C, H, W = 2, 4, 16, 16
    real_outputs = jax.random.normal(k1, (N, C, H, W), jnp.float32)
    fake_outputs = jax.random.normal(k2, (N, C, H, W), jnp.float32)

    out = discriminate_loss(real_outputs, fake_outputs)
    jax.block_until_ready(out)

    ref = _reference_loss(real_outputs, fake_outputs)
    assert abs(float(out) - float(ref)) < 1e-5, (float(out), float(ref))
    print("KERNEL_OK")
</pallas_src>

<mosaic_0001>
module attributes {stable_mosaic.version = 11 : i64} {
  func.func @kernel(%arg0: i32, %arg1: i32, %arg2: memref<1x16x128xf32, #tpu.memory_space<vmem>>, %arg3: memref<1x8x128xf32, #tpu.memory_space<vmem>>) attributes {dimension_semantics = [#tpu.dimension_semantics<parallel>, #tpu.dimension_semantics<arbitrary>], iteration_bounds = array<i64: 1, 1>, scalar_prefetch = 0 : i64, scratch_operands = 0 : i64, tpu.core_type = #tpu.core_type<tc>, window_params = [{transform_indices = @transform_0, window_bounds = array<i64: 1, 16, 128>}, {transform_indices = @transform_1, window_bounds = array<i64: 1, 8, 128>}]} {
    %c0_i32 = arith.constant 0 : i32
    %0 = arith.cmpi eq, %arg1, %c0_i32 : i32
    %1 = arith.extui %0 : i1 to i32
    %c0_i32_0 = arith.constant 0 : i32
    %2 = arith.cmpi ne, %1, %c0_i32_0 : i32
    scf.if %2 {
      %cst_10 = arith.constant 0.000000e+00 : f32
      %14 = vector.broadcast %cst_10 : f32 to vector<1x8x128xf32>
      %c0_11 = arith.constant 0 : index
      %c0_12 = arith.constant 0 : index
      %c0_13 = arith.constant 0 : index
      %15 = vector.load %arg3[%c0_11, %c0_12, %c0_13] : memref<1x8x128xf32, #tpu.memory_space<vmem>>, vector<1x8x128xf32>
      tpu.vector_store %arg3[%c0_11, %c0_12, %c0_13], %14 {strides = array<i32>} : memref<1x8x128xf32, #tpu.memory_space<vmem>>, vector<1x8x128xf32>,
    } else {
    }
    %c0 = arith.constant 0 : index
    %c0_1 = arith.constant 0 : index
    %c0_2 = arith.constant 0 : index
    %3 = vector.load %arg2[%c0, %c0_1, %c0_2] : memref<1x16x128xf32, #tpu.memory_space<vmem>>, vector<1x16x128xf32>
    %4 = vector.shape_cast %3 : vector<1x16x128xf32> to vector<16x128xf32>
    %cst = arith.constant 1.000000e+00 : f32
    %5 = vector.broadcast %cst : f32 to vector<16x128xf32>
    %6 = arith.subf %4, %5 : vector<16x128xf32>
    %7 = arith.mulf %6, %6 : vector<16x128xf32>
    %8 = vector.shape_cast %7 : vector<16x128xf32> to vector<2x8x128xf32>
    %cst_3 = arith.constant dense<0.000000e+00> : vector<8x128xf32>
    %9 = vector.multi_reduction <add>, %8, %cst_3 [0] : vector<2x8x128xf32> to vector<8x128xf32>
    %c0_4 = arith.constant 0 : index
    %c0_5 = arith.constant 0 : index
    %c0_6 = arith.constant 0 : index
    %10 = vector.load %arg3[%c0_4, %c0_5, %c0_6] : memref<1x8x128xf32, #tpu.memory_space<vmem>>, vector<1x8x128xf32>
    %11 = vector.shape_cast %9 : vector<8x128xf32> to vector<1x8x128xf32>
    %12 = arith.addf %10, %11 : vector<1x8x128xf32>
    %c0_7 = arith.constant 0 : index
    %c0_8 = arith.constant 0 : index
    %c0_9 = arith.constant 0 : index
    %13 = vector.load %arg3[%c0_7, %c0_8, %c0_9] : memref<1x8x128xf32, #tpu.memory_space<vmem>>, vector<1x8x128xf32>
    tpu.vector_store %arg3[%c0_7, %c0_8, %c0_9], %12 {strides = array<i32>} : memref<1x8x128xf32, #tpu.memory_space<vmem>>, vector<1x8x128xf32>,
    return
  }
  func.func @transform_0(%arg0: i32, %arg1: i32) -> (i32, i32, i32) {
    %c0_i32 = arith.constant 0 : i32
    %c0_i32_0 = arith.constant 0 : i32
    return %arg0, %arg1, %c0_i32 : i32, i32, i32
  }
  func.func @transform_1(%arg0: i32, %arg1: i32) -> (i32, i32, i32) {
    %c0_i32 = arith.constant 0 : i32
    %c0_i32_0 = arith.constant 0 : i32
    %c0_i32_1 = arith.constant 0 : i32
    return %arg0, %c0_i32, %c0_i32_0 : i32, i32, i32
  }
}

</mosaic_0001>

<bundles_post_ra>
// kernel: tpu_custom_call.1
= control target key start
LH: loop header
LB: loop body
LE: loop exit
PB: predicated region body
PF: predicated region fallthrough
CT: control target
= control target key end

     0   :  { %6 = vsyncpa [#allocation3], 0  ;;  %s124_s0 = inlined_call_operand.hbm [shape: f32[1,16,128], index: 0, kind: input, shape index: {}]   ;;  %s125_s1 = inlined_call_operand.hbm [shape: f32[1,8,128], index: 1, kind: output, shape index: {}]  }
   0x1   :  { %7 = vsyncpa [#allocation4], 0  ;;  %s104_s6 = smov [#allocation2]  }
   0x2   :  { %s13_s7 = sshll.u32 %s104_s6, 4  ;;  %s14_s7 = int_to_ptr.vmem [resolvable:$true] %s13_s7 }
   0x3   :  { %s68_s8 = scalar_lea.vmem %s14_s7, 256  ;;  %p73_p1 = scmp.lt.s32.totalorder %s14_s7, %s14_s7 }
   0x4   :  { %p69_p0 = scmp.ne.s32.totalorder %s14_s7, %s68_s8  ;;  %p74_p2 = scmp.lt.s32.totalorder %s68_s8, %s68_s8 }
   0x6   :  { %p75_p3 = por %p74_p2, %p73_p1 }
   0x8   :  { %p76_p4 = pnand %p75_p3, %p69_p0 }
   0xa   :  { %79 = shalt.err (!%p76_p4)
}
   0xb   :  { %s105_s9 = smov 128   ;;  %s106_s10 = smov 8  }
   0xc   :  { %19 = dma.hbm_to_vmem [thread:$0]  %s124_s0, 256, %s14_s7, [#allocation3], %s105_s9, %s105_s9, %s106_s10  }
   0xd   :  { %100 = dma.done.wait [#allocation3], 256  }
   0xe   :  { %101 = vsyncadd [#allocation3], 4294967040  ;;  %v28_v0 = vld [vmem:[#allocation2] sm:$0xff]  ;;  %v29_v1 = vld [vmem:[#allocation2 + $0x8] sm:$0xff]  ;;  %s107_s13 = smov [#allocation5]  }
   0xf   :  { %v53_v2 = vadd.f32 -1.0, %v28_v0  ;;  %v54_v3 = vadd.f32 -1.0, %v29_v1  ;;  %s44_s14 = sshll.u32 %s107_s13, 4  ;;  %s45_s14 = int_to_ptr.vmem [resolvable:$true] %s44_s14 }
  0x10   :  { %s80_s15 = scalar_lea.vmem %s45_s14, 128  ;;  %p85_p6 = scmp.lt.s32.totalorder %s45_s14, %s45_s14 }
  0x11   :  { %v32_v4 = vmul.f32 %v53_v2, %v53_v2  ;;  %v33_v5 = vmul.f32 %v54_v3, %v54_v3  ;;  %p81_p5 = scmp.ne.s32.totalorder %s45_s14, %s80_s15  ;;  %p86_p7 = scmp.lt.s32.totalorder %s80_s15, %s80_s15 }
  0x13   :  { %v34_v6 = vadd.f32 %v33_v5, %v32_v4  ;;  %p87_p8 = por %p86_p7, %p85_p6 }
  0x15   :  { %37 = vst [vmem:[#allocation5] sm:$0xff] %v34_v6  ;;  %p88_p9 = pnand %p87_p8, %p81_p5 }
  0x17   :  { %91 = shalt.err (!%p88_p9)
}
  0x18   :  { %47 = dma.vmem_to_hbm [thread:$0]  %s45_s14, 128, %s125_s1, [#allocation4]  }
  0x19   :  { %102 = dma.done.wait [#allocation4], 128  }
  0x1a   :  { %103 = vsyncadd [#allocation4], 4294967168 }
  0x1b   :  { %51 = vsyncpa [#allocation3], 1 }
  0x1c   :  { %52 = vsyncpa [#allocation4], 1 }

</bundles_post_ra>
